<compile_context>
chip_gen: v5e
topology: v5e:2x2
jax: 0.10.0
libtpu: 0.0.40
codegen_flags: <defaults>
</compile_context>

<pallas_src>
import jax
import jax.numpy as jnp
from jax.experimental import pallas as pl
from jax.experimental.pallas import tpu as pltpu

LANE = 128


# ---------------------------------------------------------------------------
# Kernel
# ---------------------------------------------------------------------------
def mlp3_kernel(x_ref, w1_ref, b1_ref, w2_ref, b2_ref, w3_ref, b3_ref, out_ref):
    # x may arrive f32 or bf16; weights are bf16; MXU accumulates in f32.
    x = x_ref[...].astype(jnp.bfloat16)                        # (TB, D_in)

    # fc1 + bias + ReLU  (elementwise kept in f32 — v5e-safe)
    h1 = jnp.dot(x, w1_ref[...], preferred_element_type=jnp.float32)
    h1 = jnp.maximum(h1 + b1_ref[...], 0.0)                    # (TB, D_bn) f32
    # dropout1: identity in eval mode

    # fc2 + bias + ReLU
    h2 = jnp.dot(h1.astype(jnp.bfloat16), w2_ref[...],
                 preferred_element_type=jnp.float32)
    h2 = jnp.maximum(h2 + b2_ref[...], 0.0)                    # (TB, D_in) f32
    # dropout2: identity in eval mode

    # fc3 (logits, lane-padded to 128 columns; padded cols are exact zeros)
    out = jnp.dot(h2.astype(jnp.bfloat16), w3_ref[...],
                  preferred_element_type=jnp.float32)
    out_ref[...] = (out + b3_ref[...]).astype(out_ref.dtype)   # (TB, 128) bf16


# ---------------------------------------------------------------------------
# One-time parameter preparation (hoisted out of the forward path)
# ---------------------------------------------------------------------------
def prepare_params(params):
    """Cast weights to bf16, keep biases f32, lane-pad fc3 to a 128-wide output."""
    d_in, d_bn = params["w1"].shape
    num_classes = params["w3"].shape[1]
    nc_pad = max(LANE, pl.cdiv(num_classes, LANE) * LANE)

    w3 = jnp.zeros((d_in, nc_pad), jnp.bfloat16)
    w3 = w3.at[:, :num_classes].set(params["w3"].astype(jnp.bfloat16))
    b3 = jnp.zeros((1, nc_pad), jnp.float32)
    b3 = b3.at[:, :num_classes].set(params["b3"].reshape(1, -1).astype(jnp.float32))

    return {
        "w1": params["w1"].astype(jnp.bfloat16),
        "b1": params["b1"].reshape(1, -1).astype(jnp.float32),
        "w2": params["w2"].astype(jnp.bfloat16),
        "b2": params["b2"].reshape(1, -1).astype(jnp.float32),
        "w3": w3,
        "b3": b3,
        "num_classes": num_classes,
    }


def _choose_batch_tile(B, tile_b):
    """Pick a batch tile that divides B exactly (no HBM padding pass over x)."""
    if B <= tile_b:
        tb = B                                   # full-extent block is always legal
    else:
        tb = None
        t = (tile_b // 8) * 8                    # multiples of 8 (sublane aligned)
        while t >= 8:
            if B % t == 0:
                tb = t
                break
            t -= 8
        if tb is None:
            # No multiple-of-8 divisor <= tile_b; use one full-batch tile rather
            # than materializing a padded copy of x.
            # TODO(synk): in-kernel row masking for huge ragged batches.
            tb = B
    # v7x has 2 TensorCores: keep >= 2 grid steps so "parallel" sharding helps.
    if tb == B and B >= 16 and B % 16 == 0:
        tb = B // 2
    return tb


# ---------------------------------------------------------------------------
# Forward pass
# ---------------------------------------------------------------------------
def mlp3_forward(x, prepped, *, tile_b=1024, trim_classes=True):
    """x: (B, input_dim) f32 or bf16.  prepped: output of prepare_params()."""
    w1, b1 = prepped["w1"], prepped["b1"]
    w2, b2 = prepped["w2"], prepped["b2"]
    w3, b3 = prepped["w3"], prepped["b3"]
    num_classes = prepped["num_classes"]

    d_in, d_bn = w1.shape
    nc_pad = w3.shape[1]

    B = x.shape[0]
    tb = _choose_batch_tile(B, tile_b)
    grid = (B // tb,)

    flops = 2 * B * (d_in * d_bn + d_bn * d_in + d_in * nc_pad)
    bytes_accessed = (x.size * x.dtype.itemsize
                      + B * nc_pad * 2                               # bf16 output
                      + (w1.size + w2.size + w3.size) * 2            # bf16 weights
                      + (b1.size + b2.size + b3.size) * 4)           # f32 biases

    out = pl.pallas_call(
        mlp3_kernel,
        out_shape=jax.ShapeDtypeStruct((B, nc_pad), jnp.bfloat16),
        grid_spec=pltpu.PrefetchScalarGridSpec(
            num_scalar_prefetch=0,
            grid=grid,
            in_specs=[
                pl.BlockSpec((tb, d_in), lambda i: (i, 0)),   # x: batch-tiled
                pl.BlockSpec(w1.shape, lambda i: (0, 0)),     # weights / biases
                pl.BlockSpec(b1.shape, lambda i: (0, 0)),     # stay VMEM-resident
                pl.BlockSpec(w2.shape, lambda i: (0, 0)),     # across the grid
                pl.BlockSpec(b2.shape, lambda i: (0, 0)),
                pl.BlockSpec(w3.shape, lambda i: (0, 0)),
                pl.BlockSpec(b3.shape, lambda i: (0, 0)),
            ],
            out_specs=pl.BlockSpec((tb, nc_pad), lambda i: (i, 0)),
        ),
        compiler_params=pltpu.CompilerParams(
            dimension_semantics=("parallel",)),
        cost_estimate=pl.CostEstimate(
            flops=flops, transcendentals=0, bytes_accessed=bytes_accessed),
    )(x, w1, b1, w2, b2, w3, b3)

    if trim_classes:
        # Tiny class-dim trim only (no batch-dim slice needed anymore).  Consumers
        # that can eat the padded (B, 128) block should pass trim_classes=False.
        out = out[:, :num_classes]
    return out


# ---------------------------------------------------------------------------
# Reference + init (PyTorch-Linear-style uniform init, weights stored [in, out])
# ---------------------------------------------------------------------------
def init_params(key, input_dim=768, bottleneck_dim=128, num_classes=10):
    ks = jax.random.split(key, 6)

    def linear(kw, kb, fan_in, fan_out):
        bound = 1.0 / (fan_in ** 0.5)
        w = jax.random.uniform(kw, (fan_in, fan_out), jnp.float32, -bound, bound)
        b = jax.random.uniform(kb, (1, fan_out), jnp.float32, -bound, bound)
        return w, b

    w1, b1 = linear(ks[0], ks[1], input_dim, bottleneck_dim)
    w2, b2 = linear(ks[2], ks[3], bottleneck_dim, input_dim)
    w3, b3 = linear(ks[4], ks[5], input_dim, num_classes)
    return {"w1": w1, "b1": b1, "w2": w2, "b2": b2, "w3": w3, "b3": b3}


def mlp3_reference(x, prepped):
    """Pure-JAX reference mirroring the kernel's bf16-weight / f32-accum math."""
    h1 = jnp.dot(x.astype(jnp.bfloat16), prepped["w1"],
                 preferred_element_type=jnp.float32)
    h1 = jnp.maximum(h1 + prepped["b1"], 0.0)
    h2 = jnp.dot(h1.astype(jnp.bfloat16), prepped["w2"],
                 preferred_element_type=jnp.float32)
    h2 = jnp.maximum(h2 + prepped["b2"], 0.0)
    out = jnp.dot(h2.astype(jnp.bfloat16), prepped["w3"],
                  preferred_element_type=jnp.float32)
    out = (out + prepped["b3"]).astype(jnp.bfloat16)
    return out[:, :prepped["num_classes"]]


if __name__ == "__main__":
    key = jax.random.PRNGKey(0)
    k_param, k_x = jax.random.split(key)

    INPUT_DIM, BOTTLENECK, NUM_CLASSES, BATCH = 768, 128, 10, 8

    raw_params = init_params(k_param, INPUT_DIM, BOTTLENECK, NUM_CLASSES)
    prepped = prepare_params(raw_params)              # one-time weight prep

    x = jax.random.normal(k_x, (BATCH, INPUT_DIM), jnp.float32)

    out = mlp3_forward(x, prepped)
    out = jax.block_until_ready(out)

    ref = mlp3_reference(x, prepped)
    assert out.shape == (BATCH, NUM_CLASSES), out.shape
    assert out.dtype == jnp.bfloat16, out.dtype
    assert jnp.allclose(out.astype(jnp.float32), ref.astype(jnp.float32),
                        atol=2e-2, rtol=2e-2), "mismatch vs reference"

    print("KERNEL_OK")
</pallas_src>

<mosaic_0001>
module attributes {stable_mosaic.version = 11 : i64} {
  func.func @mlp3_kernel(%arg0: i32, %arg1: memref<8x768xf32, #tpu.memory_space<vmem>>, %arg2: memref<768x128xbf16, #tpu.memory_space<vmem>>, %arg3: memref<1x128xf32, #tpu.memory_space<vmem>>, %arg4: memref<128x768xbf16, #tpu.memory_space<vmem>>, %arg5: memref<1x768xf32, #tpu.memory_space<vmem>>, %arg6: memref<768x128xbf16, #tpu.memory_space<vmem>>, %arg7: memref<1x128xf32, #tpu.memory_space<vmem>>, %arg8: memref<8x128xbf16, #tpu.memory_space<vmem>>) attributes {dimension_semantics = [#tpu.dimension_semantics<parallel>], iteration_bounds = array<i64: 1>, scalar_prefetch = 0 : i64, scratch_operands = 0 : i64, tpu.core_type = #tpu.core_type<tc>, window_params = [{transform_indices = @transform_0, window_bounds = array<i64: 8, 768>}, {pipeline_mode = #tpu.pipeline_mode<synchronous>, transform_indices = @transform_1, window_bounds = array<i64: 768, 128>}, {pipeline_mode = #tpu.pipeline_mode<synchronous>, transform_indices = @transform_2, window_bounds = array<i64: 1, 128>}, {pipeline_mode = #tpu.pipeline_mode<synchronous>, transform_indices = @transform_3, window_bounds = array<i64: 128, 768>}, {pipeline_mode = #tpu.pipeline_mode<synchronous>, transform_indices = @transform_4, window_bounds = array<i64: 1, 768>}, {pipeline_mode = #tpu.pipeline_mode<synchronous>, transform_indices = @transform_5, window_bounds = array<i64: 768, 128>}, {pipeline_mode = #tpu.pipeline_mode<synchronous>, transform_indices = @transform_6, window_bounds = array<i64: 1, 128>}, {transform_indices = @transform_7, window_bounds = array<i64: 8, 128>}]} {
    %c0 = arith.constant 0 : index
    %c0_0 = arith.constant 0 : index
    %0 = vector.load %arg1[%c0, %c0_0] : memref<8x768xf32, #tpu.memory_space<vmem>>, vector<8x768xf32>
    %1 = arith.truncf %0 : vector<8x768xf32> to vector<8x768xbf16>
    %c0_1 = arith.constant 0 : index
    %c0_2 = arith.constant 0 : index
    %2 = vector.load %arg2[%c0_1, %c0_2] : memref<768x128xbf16, #tpu.memory_space<vmem>>, vector<768x128xbf16>
    %cst = arith.constant dense<0.000000e+00> : vector<8x128xf32>
    %3 = tpu.matmul %1, %2, %cst {dimension_numbers = #tpu.dot_dimension_numbers<[1], [0], [0], [1], [0, 0, 1, 1], [], []>} : vector<8x768xbf16>, vector<768x128xbf16>, vector<8x128xf32> -> vector<8x128xf32>
    %c0_3 = arith.constant 0 : index
    %c0_4 = arith.constant 0 : index
    %4 = vector.load %arg3[%c0_3, %c0_4] : memref<1x128xf32, #tpu.memory_space<vmem>>, vector<1x128xf32>
    %5 = vector.broadcast %4 : vector<1x128xf32> to vector<8x128xf32>
    %6 = arith.addf %3, %5 : vector<8x128xf32>
    %cst_5 = arith.constant 0.000000e+00 : f32
    %7 = vector.broadcast %cst_5 : f32 to vector<8x128xf32>
    %8 = arith.maximumf %6, %7 : vector<8x128xf32>
    %9 = arith.truncf %8 : vector<8x128xf32> to vector<8x128xbf16>
    %c0_6 = arith.constant 0 : index
    %c0_7 = arith.constant 0 : index
    %10 = vector.load %arg4[%c0_6, %c0_7] : memref<128x768xbf16, #tpu.memory_space<vmem>>, vector<128x768xbf16>
    %cst_8 = arith.constant dense<0.000000e+00> : vector<8x768xf32>
    %11 = tpu.matmul %9, %10, %cst_8 {dimension_numbers = #tpu.dot_dimension_numbers<[1], [0], [0], [1], [0, 0, 1, 1], [], []>} : vector<8x128xbf16>, vector<128x768xbf16>, vector<8x768xf32> -> vector<8x768xf32>
    %c0_9 = arith.constant 0 : index
    %c0_10 = arith.constant 0 : index
    %12 = vector.load %arg5[%c0_9, %c0_10] : memref<1x768xf32, #tpu.memory_space<vmem>>, vector<1x768xf32>
    %13 = vector.broadcast %12 : vector<1x768xf32> to vector<8x768xf32>
    %14 = arith.addf %11, %13 : vector<8x768xf32>
    %cst_11 = arith.constant 0.000000e+00 : f32
    %15 = vector.broadcast %cst_11 : f32 to vector<8x768xf32>
    %16 = arith.maximumf %14, %15 : vector<8x768xf32>
    %17 = arith.truncf %16 : vector<8x768xf32> to vector<8x768xbf16>
    %c0_12 = arith.constant 0 : index
    %c0_13 = arith.constant 0 : index
    %18 = vector.load %arg6[%c0_12, %c0_13] : memref<768x128xbf16, #tpu.memory_space<vmem>>, vector<768x128xbf16>
    %cst_14 = arith.constant dense<0.000000e+00> : vector<8x128xf32>
    %19 = tpu.matmul %17, %18, %cst_14 {dimension_numbers = #tpu.dot_dimension_numbers<[1], [0], [0], [1], [0, 0, 1, 1], [], []>} : vector<8x768xbf16>, vector<768x128xbf16>, vector<8x128xf32> -> vector<8x128xf32>
    %c0_15 = arith.constant 0 : index
    %c0_16 = arith.constant 0 : index
    %20 = vector.load %arg7[%c0_15, %c0_16] : memref<1x128xf32, #tpu.memory_space<vmem>>, vector<1x128xf32>
    %21 = vector.broadcast %20 : vector<1x128xf32> to vector<8x128xf32>
    %22 = arith.addf %19, %21 : vector<8x128xf32>
    %23 = arith.truncf %22 : vector<8x128xf32> to vector<8x128xbf16>
    %c0_17 = arith.constant 0 : index
    %c0_18 = arith.constant 0 : index
    %24 = vector.load %arg8[%c0_17, %c0_18] : memref<8x128xbf16, #tpu.memory_space<vmem>>, vector<8x128xbf16>
    tpu.vector_store %arg8[%c0_17, %c0_18], %23 {strides = array<i32>} : memref<8x128xbf16, #tpu.memory_space<vmem>>, vector<8x128xbf16>,
    return
  }
  func.func @transform_0(%arg0: i32) -> (i32, i32) {
    %c0_i32 = arith.constant 0 : i32
    %c0_i32_0 = arith.constant 0 : i32
    return %arg0, %c0_i32 : i32, i32
  }
  func.func @transform_1(%arg0: i32) -> (i32, i32) {
    %c0_i32 = arith.constant 0 : i32
    %c0_i32_0 = arith.constant 0 : i32
    %c0_i32_1 = arith.constant 0 : i32
    return %c0_i32, %c0_i32_0 : i32, i32
  }
  func.func @transform_2(%arg0: i32) -> (i32, i32) {
    %c0_i32 = arith.constant 0 : i32
    %c0_i32_0 = arith.constant 0 : i32
    %c0_i32_1 = arith.constant 0 : i32
    return %c0_i32, %c0_i32_0 : i32, i32
  }
  func.func @transform_3(%arg0: i32) -> (i32, i32) {
    %c0_i32 = arith.constant 0 : i32
    %c0_i32_0 = arith.constant 0 : i32
    %c0_i32_1 = arith.constant 0 : i32
    return %c0_i32, %c0_i32_0 : i32, i32
  }
  func.func @transform_4(%arg0: i32) -> (i32, i32) {
    %c0_i32 = arith.constant 0 : i32
    %c0_i32_0 = arith.constant 0 : i32
    %c0_i32_1 = arith.constant 0 : i32
    return %c0_i32, %c0_i32_0 : i32, i32
  }
  func.func @transform_5(%arg0: i32) -> (i32, i32) {
    %c0_i32 = arith.constant 0 : i32
    %c0_i32_0 = arith.constant 0 : i32
    %c0_i32_1 = arith.constant 0 : i32
    return %c0_i32, %c0_i32_0 : i32, i32
  }
  func.func @transform_6(%arg0: i32) -> (i32, i32) {
    %c0_i32 = arith.constant 0 : i32
    %c0_i32_0 = arith.constant 0 : i32
    %c0_i32_1 = arith.constant 0 : i32
    return %c0_i32, %c0_i32_0 : i32, i32
  }
  func.func @transform_7(%arg0: i32) -> (i32, i32) {
    %c0_i32 = arith.constant 0 : i32
    %c0_i32_0 = arith.constant 0 : i32
    return %arg0, %c0_i32 : i32, i32
  }
}

</mosaic_0001>

<bundles_post_ra>
// kernel: tpu_custom_call.1
= control target key start
LH: loop header
LB: loop body
LE: loop exit
PB: predicated region body
PF: predicated region fallthrough
CT: control target
= control target key end

     0   :  { %12 = vsyncpa [#allocation3], 0  ;;  %s2424_s0 = inlined_call_operand.hbm [shape: f32[8,768], index: 0, kind: input, shape index: {}]   ;;  %s2425_s1 = inlined_call_operand.hbm [shape: bf16[768,128], index: 1, kind: input, shape index: {}]   ;;  %s2426_s2 = inlined_call_operand.vmem [shape: f32[1,128], index: 2, kind: input, shape index: {}]   ;;  %s2427_s3 = inlined_call_operand.hbm [shape: bf16[128,768], index: 3, kind: input, shape index: {}]   ;;  %s2428_s4 = inlined_call_operand.hbm [shape: f32[1,768], index: 4, kind: input, shape index: {}]   ;;  %s2429_s5 = inlined_call_operand.hbm [shape: bf16[768,128], index: 5, kind: input, shape index: {}]   ;;  %s2430_s6 = inlined_call_operand.vmem [shape: f32[1,128], index: 6, kind: input, shape index: {}]   ;;  %s2431_s7 = inlined_call_operand.hbm [shape: bf16[8,128], index: 7, kind: output, shape index: {}]  }
   0x1   :  { %13 = vsyncpa [#allocation6], 0 }
   0x2   :  { %14 = vsyncpa [#allocation9], 0  ;;  %s31_s26 = sshll.u32 %s2425_s1, 4  ;;  %s32_s26 = int_to_ptr.hbm [resolvable:$true] %s31_s26 }
   0x3   :  { %15 = vsyncpa [#allocation4], 0  ;;  %s2344_s27 = smov [#allocation5]   ;;  %s60_s8 = sshll.u32 %s2428_s4, 4  ;;  %s61_s8 = int_to_ptr.hbm [resolvable:$true] %s60_s8 }
   0x4   :  { %s33_s28 = sshll.u32 %s2344_s27, 4  ;;  %s2345_s9 = smov 64   ;;  %s34_s28 = int_to_ptr.vmem [resolvable:$true] %s33_s28 }
   0x5   :  { %s2346_s10 = smov 4   ;;  %s2347_s11 = smov [#allocation8]  }
   0x6   :  { %39 = dma.hbm_to_vmem [thread:$0]  %s32_s26, 6144, %s34_s28, [#allocation6], %s2345_s9, %s2345_s9, %s2346_s10  }
   0x7   :  { %s62_s12 = sshll.u32 %s2347_s11, 4  ;;  %s21_s14 = sshll.u32 %s2424_s0, 4  ;;  %s63_s12 = int_to_ptr.vmem [resolvable:$true] %s62_s12  ;;  %s22_s14 = int_to_ptr.hbm [resolvable:$true] %s21_s14 }
   0x8   :  { %65 = dma.hbm_to_vmem [thread:$0]  %s61_s8, 96, %s63_s12, [#allocation9]  }
   0x9   :  { %s46_s4 = sshll.u32 %s2427_s3, 4  ;;  %s2348_s17 = smov [#allocation2]   ;;  %s47_s4 = int_to_ptr.hbm [resolvable:$true] %s46_s4 }
   0xa   :  { %s23_s18 = sshll.u32 %s2348_s17, 4  ;;  %s2349_s19 = smov [#allocation7]   ;;  %s24_s18 = int_to_ptr.vmem [resolvable:$true] %s23_s18 }
   0xb   :  { %26 = dma.hbm_to_vmem [thread:$0]  %s22_s14, 768, %s24_s18, [#allocation3]  }
   0xc   :  { %s48_s20 = sshll.u32 %s2349_s19, 4  ;;  %s2350_s21 = smov 384   ;;  %s49_s20 = int_to_ptr.vmem [resolvable:$true] %s48_s20 }
   0xd   :  { %s2351_s22 = smov 24   ;;  %s70_s24 = sshll.u32 %s2429_s5, 4  ;;  %s71_s24 = int_to_ptr.hbm [resolvable:$true] %s70_s24 }
   0xe   :  { %54 = dma.hbm_to_vmem [thread:$0]  %s47_s4, 6144, %s49_s20, [#allocation6], %s2350_s21, %s2350_s21, %s2351_s22  }
   0xf   :  { %s2352_s25 = smov [#allocation10]  }
  0x10   :  { %s72_s26 = sshll.u32 %s2352_s25, 4  ;;  %s73_s26 = int_to_ptr.vmem [resolvable:$true] %s72_s26 }
  0x11   :  { %78 = dma.hbm_to_vmem [thread:$0]  %s71_s24, 6144, %s73_s26, [#allocation9], %s2345_s9, %s2345_s9, %s2346_s10  }
  0x12   :  { %2336 = dma.done.wait [#allocation3], 768  }
  0x13   :  { %2337 = vsyncadd [#allocation3], 4294966528 }
  0x14   :  { %2338 = dma.done.wait [#allocation6], 12288  }
  0x15   :  { %2339 = vsyncadd [#allocation6], 4294955008 }
  0x16   :  { %2340 = dma.done.wait [#allocation9], 6240  }
  0x17   :  { %2341 = vsyncadd [#allocation9], 4294961056  ;;  %v2043_v0 = vld [vmem:[#allocation5 + $0x38] sm:$0xff]  ;;  %v2042_v2 = vld [vmem:[#allocation5 + $0x30] sm:$0xff]  ;;  %s2353_s28 = smov [#allocation11]  }
  0x18   :  { %v2051_v1 = vld [vmem:[#allocation5 + $0x78] sm:$0xff]  ;;  %501 = vmatpush.bf16.msra.mxu0 %v2043_v0  ;;  %v2050_v3 = vld [vmem:[#allocation5 + $0x70] sm:$0xff]  ;;  %v2041_v8 = vld [vmem:[#allocation5 + $0x28] sm:$0xff]  ;;  %s1446_s29 = sshll.u32 %s2353_s28, 4  ;;  %s1447_s29 = int_to_ptr.vmem [resolvable:$true] %s1446_s29 }
  0x19   :  { %514 = vmatpush.bf16.msra.mxu1 %v2051_v1  ;;  %v2059_v4 = vld [vmem:[#allocation5 + $0xb8] sm:$0xff]  ;;  %v2058_v6 = vld [vmem:[#allocation5 + $0xb0] sm:$0xff]  ;;  %v2049_v9 = vld [vmem:[#allocation5 + $0x68] sm:$0xff] }
  0x1a   :  { %v2067_v5 = vld [vmem:[#allocation5 + $0xf8] sm:$0xff]  ;;  %527 = vmatpush.bf16.msra.mxu2 %v2059_v4  ;;  %v2066_v7 = vld [vmem:[#allocation5 + $0xf0] sm:$0xff]  ;;  %v2057_v10 = vld [vmem:[#allocation5 + $0xa8] sm:$0xff] }
  0x1b   :  { %540 = vmatpush.bf16.msra.mxu3 %v2067_v5  ;;  %v2065_v11 = vld [vmem:[#allocation5 + $0xe8] sm:$0xff]  ;;  %v2040_v12 = vld [vmem:[#allocation5 + $0x20] sm:$0xff]  ;;  %v2039_v16 = vld [vmem:[#allocation5 + $0x18] sm:$0xff] }
  0x1c   :  { %502 = vmatpush.bf16.msra.mxu0 %v2042_v2  ;;  %v2048_v13 = vld [vmem:[#allocation5 + $0x60] sm:$0xff]  ;;  %v2047_v17 = vld [vmem:[#allocation5 + $0x58] sm:$0xff]  ;;  %v2038_v20 = vld [vmem:[#allocation5 + $0x10] sm:$0xff] }
  0x1d   :  { %515 = vmatpush.bf16.msra.mxu1 %v2050_v3  ;;  %v2056_v14 = vld [vmem:[#allocation5 + $0xa0] sm:$0xff]  ;;  %v2055_v18 = vld [vmem:[#allocation5 + $0x98] sm:$0xff]  ;;  %v2046_v21 = vld [vmem:[#allocation5 + $0x50] sm:$0xff] }
  0x1e   :  { %528 = vmatpush.bf16.msra.mxu2 %v2058_v6  ;;  %v2064_v15 = vld [vmem:[#allocation5 + $0xe0] sm:$0xff]  ;;  %v2063_v19 = vld [vmem:[#allocation5 + $0xd8] sm:$0xff]  ;;  %v2054_v22 = vld [vmem:[#allocation5 + $0x90] sm:$0xff] }
  0x1f   :  { %541 = vmatpush.bf16.msra.mxu3 %v2066_v7  ;;  %v2062_v23 = vld [vmem:[#allocation5 + $0xd0] sm:$0xff]  ;;  %v2037_v24 = vld [vmem:[#allocation5 + $0x8] sm:$0xff]  ;;  %v2036_v27 = vld [vmem:[#allocation5] sm:$0xff] }
  0x20   :  { %503 = vmatpush.bf16.msra.mxu0 %v2041_v8  ;;  %v2045_v25 = vld [vmem:[#allocation5 + $0x48] sm:$0xff]  ;;  %v2044_v29 = vld [vmem:[#allocation5 + $0x40] sm:$0xff]  ;;  %v101_v30 = vld [vmem:[#allocation2] sm:$0xff] }
  0x21   :  { %516 = vmatpush.bf16.msra.mxu1 %v2049_v9  ;;  %v2053_v26 = vld [vmem:[#allocation5 + $0x88] sm:$0xff]  ;;  %v102_v31 = vld [vmem:[#allocation2 + $0x8] sm:$0xff]  ;;  %v2052_v34 = vld [vmem:[#allocation5 + $0x80] sm:$0xff]  ;;  %v107_v37 = vpack.c.bf16 %v101_v30, %v101_v30 }
  0x22   :  { %529 = vmatpush.bf16.msra.mxu2 %v2057_v10  ;;  %v2061_v28 = vld [vmem:[#allocation5 + $0xc8] sm:$0xff]  ;;  %v2075_v32 = vld [vmem:[#allocation5 + $0x138] sm:$0xff]  ;;  %v2074_v35 = vld [vmem:[#allocation5 + $0x130] sm:$0xff]  ;;  %v108_v38 = vpack.c.bf16 %v102_v31, %v102_v31 }
  0x23   :  { %542 = vmatpush.bf16.msra.mxu3 %v2065_v11  ;;  %v2083_v33 = vld [vmem:[#allocation5 + $0x178] sm:$0xff]  ;;  %v2082_v36 = vld [vmem:[#allocation5 + $0x170] sm:$0xff]  ;;  %v2060_v39 = vld [vmem:[#allocation5 + $0xc0] sm:$0xff] }
  0x24   :  { %504 = vmatpush.bf16.msra.mxu0 %v2040_v12  ;;  %v103_v40 = vld [vmem:[#allocation2 + $0x10] sm:$0xff]  ;;  %v104_v41 = vld [vmem:[#allocation2 + $0x18] sm:$0xff]  ;;  %v1822_v42 = vld [vmem:[#allocation7 + $0x150] sm:$0xf] }
  0x25   :  { %517 = vmatpush.bf16.msra.mxu1 %v2048_v13  ;;  %v2129_v43 = vld [vmem:[#allocation7 + $0x164] sm:$0xf0]  ;;  %v2126_v44 = vld [vmem:[#allocation7 + $0x154] sm:$0xf]  ;;  %v1824_v46 = vld [vmem:[#allocation7 + $0x168] sm:$0xf0]  ;;  %v109_v49 = vpack.c.bf16 %v103_v40, %v103_v40  ;;  %v110_v51 = vpack.c.bf16 %v104_v41, %v104_v41 }
  0x26   :  { %530 = vmatpush.bf16.msra.mxu2 %v2056_v14  ;;  %v1823_v45 = vor.u32 %v2129_v43, %v1822_v42  ;;  %v1798_v47 = vld [vmem:[#allocation7 + $0x120] sm:$0xf]  ;;  %v2123_v48 = vld [vmem:[#allocation7 + $0x134] sm:$0xf0]  ;;  %v1827_v50 = vor.u32 %v2126_v44, %v1824_v46  ;;  %v2120_v52 = vld [vmem:[#allocation7 + $0x124] sm:$0xf] }
  0x27   :  { %543 = vmatpush.bf16.msra.mxu3 %v2064_v15  ;;  %v1800_v53 = vld [vmem:[#allocation7 + $0x138] sm:$0xf0]  ;;  %v2073_v54 = vld [vmem:[#allocation5 + $0x128] sm:$0xff]  ;;  %v1799_v55 = vor.u32 %v2123_v48, %v1798_v47  ;;  %v1774_v57 = vld [vmem:[#allocation7 + $0xf0] sm:$0xf] }
  0x28   :  { %505 = vmatpush.bf16.msra.mxu0 %v2039_v16  ;;  %v2081_v56 = vld [vmem:[#allocation5 + $0x168] sm:$0xff]  ;;  %v1803_v59 = vor.u32 %v2120_v52, %v1800_v53  ;;  %v2114_v60 = vld [vmem:[#allocation7 + $0xf4] sm:$0xf]  ;;  %v2072_v63 = vld [vmem:[#allocation5 + $0x120] sm:$0xff] }
  0x29   :  { %518 = vmatpush.bf16.msra.mxu1 %v2047_v17  ;;  %v2117_v58 = vld [vmem:[#allocation7 + $0x104] sm:$0xf0]  ;;  %v1776_v61 = vld [vmem:[#allocation7 + $0x108] sm:$0xf0]  ;;  %v2080_v0 = vld [vmem:[#allocation5 + $0x160] sm:$0xff] }
  0x2a   :  { %531 = vmatpush.bf16.msra.mxu2 %v2055_v18  ;;  %v1775_v62 = vor.u32 %v2117_v58, %v1774_v57  ;;  %v1779_v1 = vor.u32 %v2114_v60, %v1776_v61  ;;  %v2071_v2 = vld [vmem:[#allocation5 + $0x118] sm:$0xff]  ;;  %v2070_v4 = vld [vmem:[#allocation5 + $0x110] sm:$0xff]  ;;  %v2069_v6 = vld [vmem:[#allocation5 + $0x108] sm:$0xff] }
  0x2b   :  { %544 = vmatpush.bf16.msra.mxu3 %v2063_v19  ;;  %v2079_v3 = vld [vmem:[#allocation5 + $0x158] sm:$0xff]  ;;  %v2078_v5 = vld [vmem:[#allocation5 + $0x150] sm:$0xff]  ;;  %v2077_v7 = vld [vmem:[#allocation5 + $0x148] sm:$0xff] }
  0x2c   :  { %506 = vmatpush.bf16.msra.mxu0 %v2038_v20  ;;  %v2068_v8 = vld [vmem:[#allocation5 + $0x100] sm:$0xff]  ;;  %v105_v10 = vld [vmem:[#allocation2 + $0x20] sm:$0xff]  ;;  %v106_v11 = vld [vmem:[#allocation2 + $0x28] sm:$0xff] }
  0x2d   :  { %519 = vmatpush.bf16.msra.mxu1 %v2046_v21  ;;  %v2076_v9 = vld [vmem:[#allocation5 + $0x140] sm:$0xff]  ;;  %v111_v12 = vpack.c.bf16 %v105_v10, %v105_v10  ;;  %v112_v13 = vpack.c.bf16 %v106_v11, %v106_v11  ;;  %v2111_v15 = vld [vmem:[#allocation7 + $0xd4] sm:$0xf0]  ;;  %v1752_v18 = vld [vmem:[#allocation7 + $0xd8] sm:$0xf0] }
  0x2e   :  { %532 = vmatpush.bf16.msra.mxu2 %v2054_v22  ;;  %v1750_v14 = vld [vmem:[#allocation7 + $0xc0] sm:$0xf]  ;;  %v2108_v16 = vld [vmem:[#allocation7 + $0xc4] sm:$0xf]  ;;  %v1830_v20 = vld [vmem:[#allocation7 + $0x158] sm:$0xf] }
  0x2f   :  { %545 = vmatpush.bf16.msra.mxu3 %v2062_v23  ;;  %v1751_v17 = vor.u32 %v2111_v15, %v1750_v14  ;;  %v1755_v19 = vor.u32 %v2108_v16, %v1752_v18  ;;  %v2130_v21 = vld [vmem:[#allocation7 + $0x16c] sm:$0xf0]  ;;  %v2127_v22 = vld [vmem:[#allocation7 + $0x15c] sm:$0xf]  ;;  %v1728_v30 = vld [vmem:[#allocation7 + $0xa8] sm:$0xf0] }
  0x30   :  { %507 = vmatpush.bf16.msra.mxu0 %v2037_v24  ;;  %v1831_v23 = vor.u32 %v2130_v21, %v1830_v20  ;;  %v1832_v24 = vld [vmem:[#allocation7 + $0x170] sm:$0xf0]  ;;  %v1806_v31 = vld [vmem:[#allocation7 + $0x128] sm:$0xf]  ;;  %v2096_v40 = vld [vmem:[#allocation7 + $0x64] sm:$0xf] }
  0x31   :  { %520 = vmatpush.bf16.msra.mxu1 %v2045_v25  ;;  %v1726_v25 = vld [vmem:[#allocation7 + $0x90] sm:$0xf]  ;;  %v1704_v42 = vld [vmem:[#allocation7 + $0x78] sm:$0xf0]  ;;  %v1782_v43 = vld [vmem:[#allocation7 + $0xf8] sm:$0xf] }
  0x32   :  { %533 = vmatpush.bf16.msra.mxu2 %v2053_v26  ;;  %v2105_v26 = vld [vmem:[#allocation7 + $0xa4] sm:$0xf0]  ;;  %v2118_v44 = vld [vmem:[#allocation7 + $0x10c] sm:$0xf0]  ;;  %v2115_v47 = vld [vmem:[#allocation7 + $0xfc] sm:$0xf] }
  0x33   :  { %546 = vmatpush.bf16.msra.mxu3 %v2061_v28  ;;  %v1727_v28 = vor.u32 %v2105_v26, %v1726_v25  ;;  %v1783_v46 = vor.u32 %v2118_v44, %v1782_v43  ;;  %v1784_v48 = vld [vmem:[#allocation7 + $0x110] sm:$0xf0]  ;;  %v1680_v53 = vld [vmem:[#allocation7 + $0x48] sm:$0xf0]  ;;  %v1654_v60 = vld [vmem:[#allocation7] sm:$0xf] }
  0x34   :  { %508 = vmatpush.bf16.msra.mxu0 %v2036_v27  ;;  %v1835_v27 = vor.u32 %v2127_v22, %v1832_v24  ;;  %v2090_v52 = vld [vmem:[#allocation7 + $0x34] sm:$0xf]  ;;  %v2109_v57 = vld [vmem:[#allocation7 + $0xcc] sm:$0xf]  ;;  %v2087_v61 = vld [vmem:[#allocation7 + $0x14] sm:$0xf0] }
  0x35   :  { %521 = vmatpush.bf16.msra.mxu1 %v2044_v29  ;;  %v2102_v29 = vld [vmem:[#allocation7 + $0x94] sm:$0xf]  ;;  %v1683_v58 = vor.u32 %v2090_v52, %v1680_v53  ;;  %v1710_v15 = vld [vmem:[#allocation7 + $0x68] sm:$0xf]  ;;  %v2100_v16 = vld [vmem:[#allocation7 + $0x7c] sm:$0xf0] }
  0x36   :  { %534 = vmatpush.bf16.msra.mxu2 %v2052_v34  ;;  %v2121_v34 = vld [vmem:[#allocation7 + $0x12c] sm:$0xf]  ;;  %v2125_v20 = vld [vmem:[#allocation7 + $0x144] sm:$0xf0]  ;;  %v1712_v21 = vld [vmem:[#allocation7 + $0x80] sm:$0xf0]  ;;  %v1711_v25 = vor.u32 %v2100_v16, %v1710_v15 }
  0x37   :  { %509 = vmatmul.bf16.vlgmr.msra.gmra.mxu0 %v107_v37  ;;  %547 = vmatpush.bf16.msra.mxu3 %v2060_v39  ;;  %v2099_v39 = vld [vmem:[#allocation7 + $0x74] sm:$0xf0]  ;;  %v2097_v18 = vld [vmem:[#allocation7 + $0x6c] sm:$0xf]  ;;  %v2122_v22 = vld [vmem:[#allocation7 + $0x134] sm:$0xf] }
  0x38   :  { %553 = vmatpush.bf16.msrb.mxu0 %v2075_v32  ;;  %522 = vmatmul.bf16.vlgmr.msra.gmra.mxu1 %v108_v38  ;;  %v1731_v32 = vor.u32 %v2102_v29, %v1728_v30  ;;  %v1702_v38 = vld [vmem:[#allocation7 + $0x60] sm:$0xf]  ;;  %v2094_v29 = vld [vmem:[#allocation7 + $0x4c] sm:$0xf0]  ;;  %v2091_v30 = vld [vmem:[#allocation7 + $0x3c] sm:$0xf] }
  0x39   :  { %566 = vmatpush.bf16.msrb.mxu1 %v2083_v33  ;;  %535 = vmatmul.bf16.vlgmr.msra.gmra.mxu2 %v109_v49  ;;  %v2124_v33 = vld [vmem:[#allocation7 + $0x13c] sm:$0xf0]  ;;  %v1703_v41 = vor.u32 %v2099_v39, %v1702_v38  ;;  %v1678_v49 = vld [vmem:[#allocation7 + $0x30] sm:$0xf]  ;;  %v1792_v38 = vld [vmem:[#allocation7 + $0x118] sm:$0xf0] }
  0x3a   :  { %883 = vmatpush.bf16.msrb.mxu2 %v1823_v45  ;;  %548 = vmatmul.bf16.vlgmr.msra.gmra.mxu3 %v110_v51  ;;  %v1707_v45 = vor.u32 %v2096_v40, %v1704_v42  ;;  %v2093_v51 = vld [vmem:[#allocation7 + $0x44] sm:$0xf0]  ;;  %v2088_v43 = vld [vmem:[#allocation7 + $0x1c] sm:$0xf0]  ;;  %v2085_v44 = vld [vmem:[#allocation7 + $0xc] sm:$0xf] }
  0x3b   :  { %896 = vmatpush.bf16.msrb.mxu3 %v1827_v50  ;;  %v1787_v50 = vor.u32 %v2115_v47, %v1784_v48  ;;  %v1662_v42 = vld [vmem:[#allocation7 + $0x8] sm:$0xf]  ;;  %v1766_v47 = vld [vmem:[#allocation7 + $0xd0] sm:$0xf]  ;;  %v1768_v52 = vld [vmem:[#allocation7 + $0xe8] sm:$0xf0] }
  0x3c   :  { %554 = vmatpush.bf16.msrb.mxu0 %v2074_v35  ;;  %v1808_v35 = vld [vmem:[#allocation7 + $0x140] sm:$0xf0]  ;;  %v2113_v48 = vld [vmem:[#allocation7 + $0xe4] sm:$0xf0]  ;;  %v2086_v15 = vld [vmem:[#allocation7 + $0x14] sm:$0xf] }
  0x3d   :  { %567 = vmatpush.bf16.msrb.mxu1 %v2082_v36  ;;  %v1807_v36 = vor.u32 %v2124_v33, %v1806_v31  ;;  %v1811_v37 = vor.u32 %v2121_v34, %v1808_v35  ;;  %v1790_v33 = vld [vmem:[#allocation7 + $0x100] sm:$0xf]  ;;  %v2119_v34 = vld [vmem:[#allocation7 + $0x114] sm:$0xf0]  ;;  %v1672_v16 = vld [vmem:[#allocation7 + $0x28] sm:$0xf0] }
  0x3e   :  { %884 = vmatpush.bf16.msrb.mxu2 %v1799_v55  ;;  %v1758_v55 = vld [vmem:[#allocation7 + $0xc8] sm:$0xf] }
  0x3f   :  { %897 = vmatpush.bf16.msrb.mxu3 %v1803_v59  ;;  %v1760_v59 = vld [vmem:[#allocation7 + $0xe0] sm:$0xf0] }
  0x40   :  { %555 = vmatpush.bf16.msrb.mxu0 %v2073_v54  ;;  %v1679_v54 = vor.u32 %v2093_v51, %v1678_v49  ;;  %v2110_v51 = vld [vmem:[#allocation7 + $0xd4] sm:$0xf] }
  0x41   :  { %568 = vmatpush.bf16.msrb.mxu1 %v2081_v56  ;;  %v2112_v56 = vld [vmem:[#allocation7 + $0xdc] sm:$0xf0]  ;;  %v1771_v53 = vor.u32 %v2110_v51, %v1768_v52  ;;  %v2133_v51 = vld [vmem:[#allocation10 + $0x8] sm:$0xff] }
  0x42   :  { %885 = vmatpush.bf16.msrb.mxu2 %v1775_v62  ;;  %v1759_v62 = vor.u32 %v2112_v56, %v1758_v55  ;;  %v2107_v55 = vld [vmem:[#allocation7 + $0xb4] sm:$0xf0]  ;;  %v2104_v56 = vld [vmem:[#allocation7 + $0xa4] sm:$0xf]  ;;  %v2141_v52 = vld [vmem:[#allocation10 + $0x48] sm:$0xff] }
  0x43   :  { %898 = vmatpush.bf16.msrb.mxu3 %v1779_v1  ;;  %v1734_v1 = vld [vmem:[#allocation7 + $0x98] sm:$0xf] }
  0x44   :  { %556 = vmatpush.bf16.msrb.mxu0 %v2072_v63  ;;  %v2084_v63 = vld [vmem:[#allocation7 + $0x4] sm:$0xf] }
  0x45   :  { %569 = vmatpush.bf16.msrb.mxu1 %v2080_v0  ;;  %v1656_v0 = vld [vmem:[#allocation7 + $0x18] sm:$0xf0] }
  0x46   :  { %886 = vmatpush.bf16.msrb.mxu2 %v1751_v17  ;;  %v1659_v10 = vor.u32 %v2084_v63, %v1656_v0 }
  0x47   :  { %899 = vmatpush.bf16.msrb.mxu3 %v1755_v19  ;;  %v1814_v19 = vld [vmem:[#allocation7 + $0x130] sm:$0xf] }
  0x48   :  { %557 = vmatpush.bf16.msrb.mxu0 %v2071_v2  ;;  %v1763_v2 = vor.u32 %v2109_v57, %v1760_v59  ;;  %v1815_v24 = vor.u32 %v2125_v20, %v1814_v19  ;;  %v1675_v20 = vor.u32 %v2086_v15, %v1672_v16  ;;  %v2164_v15 = vld [vmem:[#allocation10 + $0x100] sm:$0xff] }
  0x49   :  { %570 = vmatpush.bf16.msrb.mxu1 %v2079_v3  ;;  %v2106_v3 = vld [vmem:[#allocation7 + $0xac] sm:$0xf0]  ;;  %v2172_v16 = vld [vmem:[#allocation10 + $0x140] sm:$0xff] }
  0x4a   :  { %887 = vmatpush.bf16.msrb.mxu2 %v1727_v28  ;;  %v1686_v28 = vld [vmem:[#allocation7 + $0x38] sm:$0xf] }
  0x4b   :  { %900 = vmatpush.bf16.msrb.mxu3 %v1731_v32  ;;  %v1687_v31 = vor.u32 %v2094_v29, %v1686_v28  ;;  %v1688_v32 = vld [vmem:[#allocation7 + $0x50] sm:$0xf0] }
  0x4c   :  { %558 = vmatpush.bf16.msrb.mxu0 %v2070_v4  ;;  %v2103_v4 = vld [vmem:[#allocation7 + $0x9c] sm:$0xf]  ;;  %v1691_v35 = vor.u32 %v2091_v30, %v1688_v32  ;;  %v2137_v29 = vld [vmem:[#allocation10 + $0x28] sm:$0xff] }
  0x4d   :  { %571 = vmatpush.bf16.msrb.mxu1 %v2078_v5  ;;  %v1736_v5 = vld [vmem:[#allocation7 + $0xb0] sm:$0xf0] }
  0x4e   :  { %888 = vmatpush.bf16.msrb.mxu2 %v1703_v41  ;;  %v1739_v17 = vor.u32 %v2103_v4, %v1736_v5  ;;  %v1694_v5 = vld [vmem:[#allocation7 + $0x40] sm:$0xf]  ;;  %v2145_v30 = vld [vmem:[#allocation10 + $0x68] sm:$0xff] }
  0x4f   :  { %901 = vmatpush.bf16.msrb.mxu3 %v1707_v45  ;;  %v1663_v45 = vor.u32 %v2088_v43, %v1662_v42  ;;  %v2135_v43 = vld [vmem:[#allocation10 + $0x18] sm:$0xff] }
  0x50   :  { %559 = vmatpush.bf16.msrb.mxu0 %v2069_v6  ;;  %v1655_v6 = vor.u32 %v2087_v61, %v1654_v60  ;;  %v1718_v60 = vld [vmem:[#allocation7 + $0x70] sm:$0xf]  ;;  %v2101_v61 = vld [vmem:[#allocation7 + $0x84] sm:$0xf0] }
  0x51   :  { %572 = vmatpush.bf16.msrb.mxu1 %v2077_v7  ;;  %v1838_v7 = vld [vmem:[#allocation7 + $0x160] sm:$0xf] }
  0x52   :  { %889 = vmatpush.bf16.msrb.mxu2 %v1679_v54  ;;  %v1742_v54 = vld [vmem:[#allocation7 + $0xa0] sm:$0xf] }
  0x53   :  { %902 = vmatpush.bf16.msrb.mxu3 %v1683_v58  ;;  %v1743_v57 = vor.u32 %v2107_v55, %v1742_v54  ;;  %v1744_v58 = vld [vmem:[#allocation7 + $0xb8] sm:$0xf0]  ;;  %v2160_v54 = vld [vmem:[#allocation10 + $0xe0] sm:$0xff] }
  0x54   :  { %560 = vmatpush.bf16.msrb.mxu0 %v2068_v8  ;;  %v2131_v8 = vld [vmem:[#allocation7 + $0x174] sm:$0xf0]  ;;  %v1747_v59 = vor.u32 %v2104_v56, %v1744_v58  ;;  %v2132_v55 = vld [vmem:[#allocation10] sm:$0xff]  ;;  %v2179_v58 = vld [vmem:[#allocation10 + $0x178] sm:$0xff] }
  0x55   :  { %573 = vmatpush.bf16.msrb.mxu1 %v2076_v9  ;;  %v2128_v9 = vld [vmem:[#allocation7 + $0x164] sm:$0xf]  ;;  %v1839_v11 = vor.u32 %v2131_v8, %v1838_v7 }
  0x56   :  { %890 = vmatpush.bf16.msrb.mxu2 %v1655_v6  ;;  %v2095_v6 = vld [vmem:[#allocation7 + $0x54] sm:$0xf0]  ;;  %v2092_v8 = vld [vmem:[#allocation7 + $0x44] sm:$0xf] }
  0x57   :  { %561 = vmatmul.bf16.vlgmr.msrb.gmra.mxu0 %v111_v12  ;;  %v1840_v12 = vld [vmem:[#allocation7 + $0x178] sm:$0xf0]  ;;  %903 = vmatpush.bf16.msrb.mxu3 %v1659_v10  ;;  %v2190_v10 = vld [vmem:[%s2426_s2] ss:$0 sm:$0xff]  ;;  %v2140_v56 = vld [vmem:[#allocation10 + $0x40] sm:$0xff] }
  0x58   :  { %574 = vmatmul.bf16.vlgmr.msrb.gmra.mxu1 %v112_v13  ;;  %909 = vmatpush.bf16.msra.mxu0 %v1831_v23  ;;  %v1735_v13 = vor.u32 %v2106_v3, %v1734_v1  ;;  %v1843_v14 = vor.u32 %v2128_v9, %v1840_v12  ;;  %v1816_v23 = vld [vmem:[#allocation7 + $0x148] sm:$0xf0]  ;;  %v1719_v1 = vor.u32 %v2101_v61, %v1718_v60  ;;  %v1696_v9 = vld [vmem:[#allocation7 + $0x58] sm:$0xf0] }
  0x59   :  { %922 = vmatpush.bf16.msra.mxu1 %v1835_v27  ;;  %v1819_v26 = vor.u32 %v2122_v22, %v1816_v23  ;;  %v1715_v27 = vor.u32 %v2097_v18, %v1712_v21  ;;  %v1699_v12 = vor.u32 %v2092_v8, %v1696_v9  ;;  %v2139_v23 = vld [vmem:[#allocation10 + $0x38] sm:$0xff]  ;;  %v2150_v61 = vld [vmem:[#allocation10 + $0x90] sm:$0xff]  ;;  %v2176_v8 = vld [vmem:[#allocation10 + $0x160] sm:$0xff] }
  0x5a   :  { %935 = vmatpush.bf16.msra.mxu2 %v1839_v11  ;;  %v1695_v11 = vor.u32 %v2095_v6, %v1694_v5  ;;  %v2159_v60 = vld [vmem:[#allocation10 + $0xd8] sm:$0xff]  ;;  %v2169_v5 = vld [vmem:[#allocation10 + $0x128] sm:$0xff] }
  0x5b   :  { %948 = vmatpush.bf16.msra.mxu3 %v1843_v14  ;;  %v2089_v14 = vld [vmem:[#allocation7 + $0x24] sm:$0xf0]  ;;  %v2177_v6 = vld [vmem:[#allocation10 + $0x168] sm:$0xff]  ;;  %v2167_v9 = vld [vmem:[#allocation10 + $0x118] sm:$0xff] }
  0x5c   :  { %910 = vmatpush.bf16.msra.mxu0 %v1807_v36  ;;  %v1791_v36 = vor.u32 %v2119_v34, %v1790_v33 }
  0x5d   :  { %923 = vmatpush.bf16.msra.mxu1 %v1811_v37  ;;  %v2116_v37 = vld [vmem:[#allocation7 + $0x104] sm:$0xf] }
  0x5e   :  { %936 = vmatpush.bf16.msra.mxu2 %v1815_v24  ;;  %v1795_v39 = vor.u32 %v2116_v37, %v1792_v38  ;;  %v2147_v24 = vld [vmem:[#allocation10 + $0x78] sm:$0xff] }
  0x5f   :  { %949 = vmatpush.bf16.msra.mxu3 %v1819_v26  ;;  %v2138_v26 = vld [vmem:[#allocation10 + $0x30] sm:$0xff] }
  0x60   :  { %911 = vmatpush.bf16.msra.mxu0 %v1783_v46  ;;  %v1664_v46 = vld [vmem:[#allocation7 + $0x20] sm:$0xf0] }
  0x61   :  { %924 = vmatpush.bf16.msra.mxu1 %v1787_v50  ;;  %v1667_v49 = vor.u32 %v2085_v44, %v1664_v46  ;;  %v1767_v50 = vor.u32 %v2113_v48, %v1766_v47  ;;  %v2143_v44 = vld [vmem:[#allocation10 + $0x58] sm:$0xff]  ;;  %v2162_v46 = vld [vmem:[#allocation10 + $0xf0] sm:$0xff] }
  0x62   :  { %937 = vmatpush.bf16.msra.mxu2 %v1791_v36  ;;  %v2144_v36 = vld [vmem:[#allocation10 + $0x60] sm:$0xff]  ;;  %v2134_v47 = vld [vmem:[#allocation10 + $0x10] sm:$0xff] }
  0x63   :  { %950 = vmatpush.bf16.msra.mxu3 %v1795_v39  ;;  %v2155_v39 = vld [vmem:[#allocation10 + $0xb8] sm:$0xff]  ;;  %v2142_v48 = vld [vmem:[#allocation10 + $0x50] sm:$0xff] }
  0x64   :  { %912 = vmatpush.bf16.msra.mxu0 %v1759_v62  ;;  %v2098_v62 = vld [vmem:[#allocation7 + $0x74] sm:$0xf] }
  0x65   :  { %925 = vmatpush.bf16.msra.mxu1 %v1763_v2  ;;  %v1720_v2 = vld [vmem:[#allocation7 + $0x88] sm:$0xf0] }
  0x66   :  { %938 = vmatpush.bf16.msra.mxu2 %v1767_v50  ;;  %v1723_v4 = vor.u32 %v2098_v62, %v1720_v2  ;;  %v2161_v50 = vld [vmem:[#allocation10 + $0xe8] sm:$0xff]  ;;  %v2158_v62 = vld [vmem:[#allocation10 + $0xd0] sm:$0xff] }
  0x67   :  { %951 = vmatpush.bf16.msra.mxu3 %v1771_v53  ;;  %v2152_v53 = vld [vmem:[#allocation10 + $0xa0] sm:$0xff]  ;;  %v2178_v2 = vld [vmem:[#allocation10 + $0x170] sm:$0xff] }
  0x68   :  { %913 = vmatpush.bf16.msra.mxu0 %v1735_v13  ;;  %v1670_v13 = vld [vmem:[#allocation7 + $0x10] sm:$0xf] }
  0x69   :  { %926 = vmatpush.bf16.msra.mxu1 %v1739_v17  ;;  %v1671_v18 = vor.u32 %v2089_v14, %v1670_v13  ;;  %v2165_v13 = vld [vmem:[#allocation10 + $0x108] sm:$0xff] }
  0x6a   :  { %939 = vmatpush.bf16.msra.mxu2 %v1743_v57  ;;  %v2171_v57 = vld [vmem:[#allocation10 + $0x138] sm:$0xff]  ;;  %v2173_v14 = vld [vmem:[#allocation10 + $0x148] sm:$0xff] }
  0x6b   :  { %952 = vmatpush.bf16.msra.mxu3 %v1747_v59  ;;  %v2151_v59 = vld [vmem:[#allocation10 + $0x98] sm:$0xff] }
  0x6c   :  { %914 = vmatpush.bf16.msra.mxu0 %v1711_v25 }
  0x6d   :  { %927 = vmatpush.bf16.msra.mxu1 %v1715_v27  ;;  %v2146_v27 = vld [vmem:[#allocation10 + $0x70] sm:$0xff] }
  0x6e   :  { %940 = vmatpush.bf16.msra.mxu2 %v1719_v1  ;;  %v2170_v1 = vld [vmem:[#allocation10 + $0x130] sm:$0xff] }
  0x6f   :  { %953 = vmatpush.bf16.msra.mxu3 %v1723_v4  ;;  %v2156_v4 = vld [vmem:[#allocation10 + $0xc0] sm:$0xff] }
  0x70   :  { %915 = vmatpush.bf16.msra.mxu0 %v1687_v31 }
  0x71   :  { %928 = vmatpush.bf16.msra.mxu1 %v1691_v35  ;;  %v2136_v35 = vld [vmem:[#allocation10 + $0x20] sm:$0xff] }
  0x72   :  { %941 = vmatpush.bf16.msra.mxu2 %v1695_v11  ;;  %v2166_v11 = vld [vmem:[#allocation10 + $0x110] sm:$0xff] }
  0x73   :  { %954 = vmatpush.bf16.msra.mxu3 %v1699_v12  ;;  %v2174_v12 = vld [vmem:[#allocation10 + $0x150] sm:$0xff] }
  0x74   :  { %916 = vmatpush.bf16.msra.mxu0 %v1663_v45  ;;  %v2154_v45 = vld [vmem:[#allocation10 + $0xb0] sm:$0xff] }
  0x75   :  { %929 = vmatpush.bf16.msra.mxu1 %v1667_v49  ;;  %v2153_v49 = vld [vmem:[#allocation10 + $0xa8] sm:$0xff] }
  0x76   :  { %942 = vmatpush.bf16.msra.mxu2 %v1671_v18 }
  0x77   :  { %955 = vmatpush.bf16.msra.mxu3 %v1675_v20 }
  0x78   :  { %1361 = vmatpush.bf16.msrb.mxu0 %v2139_v23 }
  0x79   :  { %1374 = vmatpush.bf16.msrb.mxu1 %v2147_v24 }
  0x7c   :  { %1362 = vmatpush.bf16.msrb.mxu0 %v2138_v26 }
  0x7d   :  { %1375 = vmatpush.bf16.msrb.mxu1 %v2146_v27 }
  0x80   :  { %1363 = vmatpush.bf16.msrb.mxu0 %v2137_v29 }
  0x81   :  { %1376 = vmatpush.bf16.msrb.mxu1 %v2145_v30 }
  0x84   :  { %1364 = vmatpush.bf16.msrb.mxu0 %v2136_v35 }
  0x85   :  { %1377 = vmatpush.bf16.msrb.mxu1 %v2144_v36 }
  0x88   :  { %1365 = vmatpush.bf16.msrb.mxu0 %v2135_v43 }
  0x89   :  { %1378 = vmatpush.bf16.msrb.mxu1 %v2143_v44 }
  0x8c   :  { %1366 = vmatpush.bf16.msrb.mxu0 %v2134_v47 }
  0x8d   :  { %1379 = vmatpush.bf16.msrb.mxu1 %v2142_v48 }
  0x90   :  { %1367 = vmatpush.bf16.msrb.mxu0 %v2133_v51 }
  0x91   :  { %1380 = vmatpush.bf16.msrb.mxu1 %v2141_v52 }
  0x94   :  { %1368 = vmatpush.bf16.msrb.mxu0 %v2132_v55 }
  0x95   :  { %1381 = vmatpush.bf16.msrb.mxu1 %v2140_v56 }
  0xb4   :  { %v510_v40 = vpop.f32.mrf.mxu0 }
  0xb5   :  { %v523_v41 = vpop.f32.mrf.mxu1  ;;  %v511_v17 = vadd.f32 %v2190_v10, %v510_v40  ;;  %v2163_v40 = vld [vmem:[#allocation10 + $0xf8] sm:$0xff] }
  0xb6   :  { %v2175_v10 = vld [vmem:[#allocation10 + $0x158] sm:$0xff] }
  0xb7   :  { %v524_v22 = vadd.f32 %v523_v41, %v511_v17  ;;  %v629_v17 = vld [vmem:[#allocation8] sm:$0x3f] }
  0xb8   :  { %v633_v18 = vperm.slane %v629_v17, 2  ;;  %v631_v24 = vperm.slane %v629_v17, 0  ;;  %v636_v43 = vperm.slane %v629_v17, 5 }
  0xbc   :  { %v512_v63 = vpop.f32.mrf.mxu0  ;;  %v536_v3 = vpop.f32.mrf.mxu2 }
  0xbd   :  { %v525_v0 = vpop.f32.mrf.mxu1  ;;  %v549_v7 = vpop.f32.mrf.mxu3  ;;  %v537_v25 = vadd.f32 %v536_v3, %v524_v22  ;;  %v2149_v63 = vld [vmem:[#allocation10 + $0x88] sm:$0xff]  ;;  %v2148_v3 = vld [vmem:[#allocation10 + $0x80] sm:$0xff] }
  0xbe   :  { %v2157_v0 = vld [vmem:[#allocation10 + $0xc8] sm:$0xff] }
  0xbf   :  { %v550_v28 = vadd.f32 %v549_v7, %v537_v25  ;;  %v2168_v7 = vld [vmem:[#allocation10 + $0x120] sm:$0xff]  ;;  %v632_v25 = vperm.slane %v629_v17, 1 }
  0xc4   :  { %v538_v19 = vpop.f32.mrf.mxu2 }
  0xc5   :  { %v551_v21 = vpop.f32.mrf.mxu3  ;;  %v634_v19 = vperm.slane %v629_v17, 3 }
  0xd4   :  { %v562_v31 = vpop.f32.mrf.mxu0 }
  0xd5   :  { %v575_v32 = vpop.f32.mrf.mxu1  ;;  %v563_v33 = vadd.f32 %v562_v31, %v550_v28 }
  0xd7   :  { %v576_v34 = vadd.f32 %v575_v32, %v563_v33 }
  0xd9   :  { %v579_v37 = vmax.f32 %v576_v34, 0.0 }
  0xdb   :  { %v580_v38 = vpack.c.bf16 %v579_v37, %v579_v37 }
  0xdc   :  { %v564_v41 = vpop.f32.mrf.mxu0 }
  0xdd   :  { %v577_v42 = vpop.f32.mrf.mxu1  ;;  %891 = vmatmul.bf16.vlgmr.msrb.gmra.mxu2 %v580_v38  ;;  %904 = vmatmul.bf16.vlgmr.msrb.gmra.mxu3 %v580_v38 }
  0xde   :  { %917 = vmatmul.bf16.vlgmr.msra.gmra.mxu0 %v580_v38  ;;  %930 = vmatmul.bf16.vlgmr.msra.gmra.mxu1 %v580_v38  ;;  %v635_v42 = vperm.slane %v629_v17, 4 }
  0xdf   :  { %1387 = vmatpush.bf16.msrb.mxu2 %v2155_v39  ;;  %1400 = vmatpush.bf16.msrb.mxu3 %v2163_v40 }
  0xe0   :  { %1413 = vmatpush.bf16.msra.mxu0 %v2171_v57  ;;  %1426 = vmatpush.bf16.msra.mxu1 %v2179_v58 }
  0xe3   :  { %1388 = vmatpush.bf16.msrb.mxu2 %v2154_v45  ;;  %1401 = vmatpush.bf16.msrb.mxu3 %v2162_v46 }
  0xe4   :  { %1414 = vmatpush.bf16.msra.mxu0 %v2170_v1  ;;  %1427 = vmatpush.bf16.msra.mxu1 %v2178_v2 }
  0xe7   :  { %1389 = vmatpush.bf16.msrb.mxu2 %v2153_v49  ;;  %1402 = vmatpush.bf16.msrb.mxu3 %v2161_v50 }
  0xe8   :  { %1415 = vmatpush.bf16.msra.mxu0 %v2169_v5  ;;  %1428 = vmatpush.bf16.msra.mxu1 %v2177_v6 }
  0xeb   :  { %1390 = vmatpush.bf16.msrb.mxu2 %v2152_v53  ;;  %1403 = vmatpush.bf16.msrb.mxu3 %v2160_v54  ;;  %v2191_v54 = vld [vmem:[%s2430_s6] ss:$0 sm:$0xff]  ;;  %s1448_s6 = sshll.u32 %s2431_s7, 4  ;;  %s1449_s6 = int_to_ptr.hbm [resolvable:$true] %s1448_s6 }
  0xec   :  { %1416 = vmatpush.bf16.msra.mxu0 %v2168_v7  ;;  %1429 = vmatpush.bf16.msra.mxu1 %v2176_v8 }
  0xed   :  { %943 = vmatmul.bf16.vlgmr.msra.gmra.mxu2 %v580_v38  ;;  %956 = vmatmul.bf16.vlgmr.msra.gmra.mxu3 %v580_v38 }
  0xef   :  { %1391 = vmatpush.bf16.msrb.mxu2 %v2151_v59  ;;  %1404 = vmatpush.bf16.msrb.mxu3 %v2159_v60 }
  0xf0   :  { %1417 = vmatpush.bf16.msra.mxu0 %v2167_v9  ;;  %1430 = vmatpush.bf16.msra.mxu1 %v2175_v10 }
  0xf3   :  { %1392 = vmatpush.bf16.msrb.mxu2 %v2150_v61  ;;  %1405 = vmatpush.bf16.msrb.mxu3 %v2158_v62 }
  0xf4   :  { %1418 = vmatpush.bf16.msra.mxu0 %v2166_v11  ;;  %1431 = vmatpush.bf16.msra.mxu1 %v2174_v12 }
  0xf7   :  { %1393 = vmatpush.bf16.msrb.mxu2 %v2149_v63  ;;  %1406 = vmatpush.bf16.msrb.mxu3 %v2157_v0 }
  0xf8   :  { %1419 = vmatpush.bf16.msra.mxu0 %v2165_v13  ;;  %1432 = vmatpush.bf16.msra.mxu1 %v2173_v14 }
  0xfb   :  { %1394 = vmatpush.bf16.msrb.mxu2 %v2148_v3  ;;  %1407 = vmatpush.bf16.msrb.mxu3 %v2156_v4 }
  0xfc   :  { %1420 = vmatpush.bf16.msra.mxu0 %v2164_v15  ;;  %1433 = vmatpush.bf16.msra.mxu1 %v2172_v16 }
 0x15b   :  { %v918_v20 = vpop.f32.mrf.mxu0  ;;  %v931_v21 = vpop.f32.mrf.mxu1 }
 0x15c   :  { %v919_v22 = vadd.f32 %v918_v20, %v633_v18  ;;  %v932_v23 = vadd.f32 %v931_v21, %v634_v19 }
 0x15e   :  { %v963_v26 = vmax.f32 %v919_v22, 0.0  ;;  %v964_v27 = vmax.f32 %v932_v23, 0.0 }
 0x160   :  { %v969_v28 = vpack.c.bf16 %v963_v26, %v963_v26  ;;  %v970_v29 = vpack.c.bf16 %v964_v27, %v964_v27  ;;  %v892_v30 = vpop.f32.mrf.mxu2  ;;  %v905_v31 = vpop.f32.mrf.mxu3 }
 0x161   :  { %v893_v32 = vadd.f32 %v892_v30, %v631_v24  ;;  %v906_v33 = vadd.f32 %v905_v31, %v632_v25 }
 0x162   :  { %1395 = vmatmul.bf16.vlgmr.msrb.gmra.mxu2 %v969_v28  ;;  %1408 = vmatmul.bf16.vlgmr.msrb.gmra.mxu3 %v970_v29 }
 0x163   :  { %v961_v34 = vmax.f32 %v893_v32, 0.0  ;;  %v962_v35 = vmax.f32 %v906_v33, 0.0  ;;  %v920_v36 = vpop.f32.mrf.mxu0  ;;  %v933_v37 = vpop.f32.mrf.mxu1 }
 0x165   :  { %v967_v38 = vpack.c.bf16 %v961_v34, %v961_v34  ;;  %v968_v39 = vpack.c.bf16 %v962_v35, %v962_v35 }
 0x167   :  { %1369 = vmatmul.bf16.vlgmr.msrb.gmra.mxu0 %v967_v38  ;;  %1382 = vmatmul.bf16.vlgmr.msrb.gmra.mxu1 %v968_v39 }
 0x168   :  { %v894_v40 = vpop.f32.mrf.mxu2  ;;  %v907_v41 = vpop.f32.mrf.mxu3 }
 0x170   :  { %v944_v44 = vpop.f32.mrf.mxu2  ;;  %v957_v45 = vpop.f32.mrf.mxu3 }
 0x171   :  { %v945_v46 = vadd.f32 %v944_v44, %v635_v42  ;;  %v958_v47 = vadd.f32 %v957_v45, %v636_v43 }
 0x173   :  { %v965_v48 = vmax.f32 %v945_v46, 0.0  ;;  %v966_v49 = vmax.f32 %v958_v47, 0.0 }
 0x175   :  { %v971_v50 = vpack.c.bf16 %v965_v48, %v965_v48  ;;  %v972_v51 = vpack.c.bf16 %v966_v49, %v966_v49 }
 0x177   :  { %1421 = vmatmul.bf16.vlgmr.msra.gmra.mxu0 %v971_v50  ;;  %1434 = vmatmul.bf16.vlgmr.msra.gmra.mxu1 %v972_v51 }
 0x178   :  { %v946_v52 = vpop.f32.mrf.mxu2  ;;  %v959_v53 = vpop.f32.mrf.mxu3 }
 0x1e4   :  { %v1370_v55 = vpop.f32.mrf.mxu0  ;;  %v1383_v56 = vpop.f32.mrf.mxu1 }
 0x1e5   :  { %v1396_v57 = vpop.f32.mrf.mxu2  ;;  %v1409_v58 = vpop.f32.mrf.mxu3  ;;  %v1371_v59 = vadd.f32 %v2191_v54, %v1370_v55 }
 0x1e7   :  { %v1384_v60 = vadd.f32 %v1383_v56, %v1371_v59 }
 0x1e9   :  { %v1397_v1 = vadd.f32 %v1396_v57, %v1384_v60 }
 0x1eb   :  { %v1410_v2 = vadd.f32 %v1409_v58, %v1397_v1 }
 0x1ec   :  { %v1372_v61 = vpop.f32.mrf.mxu0  ;;  %v1385_v62 = vpop.f32.mrf.mxu1 }
 0x1ed   :  { %v1398_v63 = vpop.f32.mrf.mxu2  ;;  %v1411_v0 = vpop.f32.mrf.mxu3 }
 0x1f4   :  { %v1422_v3 = vpop.f32.mrf.mxu0  ;;  %v1435_v4 = vpop.f32.mrf.mxu1 }
 0x1f5   :  { %v1423_v5 = vadd.f32 %v1422_v3, %v1410_v2 }
 0x1f7   :  { %v1436_v6 = vadd.f32 %v1435_v4, %v1423_v5 }
 0x1f9   :  { %v1439_v7 = vpack.c.bf16 %v1436_v6, %v1436_v6 }
 0x1fb   :  { %1440 = vst [vmem:[#allocation11] sm:$0xf] %v1439_v7 }
 0x1fc   :  { %v1424_v8 = vpop.f32.mrf.mxu0  ;;  %v1437_v9 = vpop.f32.mrf.mxu1  ;;  %1451 = dma.vmem_to_hbm [thread:$0]  %s1447_s29, 64, %s1449_s6, [#allocation4]  }
 0x1fd   :  { %2342 = dma.done.wait [#allocation4], 64  }
 0x1fe   :  { %2343 = vsyncadd [#allocation4], 4294967232 }
 0x1ff   :  { %1456 = vsyncpa [#allocation3], 1 }
 0x200   :  { %1457 = vsyncpa [#allocation6], 1 }
 0x201   :  { %1458 = vsyncpa [#allocation9], 1 }
 0x202   :  { %1459 = vsyncpa [#allocation4], 1 }

</bundles_post_ra>
